<compile_context>
chip_gen: v7x
topology: tpu7x:2x2x1
jax: 0.10.0
libtpu: 0.0.40
codegen_flags: <defaults>
</compile_context>

<pallas_src>
import jax
import jax.numpy as jnp
from jax.experimental import pallas as pl
from jax.experimental.pallas import tpu as pltpu

_PAD = 4                          # temporal halo (>= max offset 3); keeps Tp 8-aligned
_OFFSETS = tuple(range(-3, 4))    # 7 distinct temporal offsets after tap merging


def sgp_kernel(x_ref, wp_ref, b1_ref, w2t_ref, bias_ref, o_ref):
    bblk, T, C = o_ref.shape
    Ch = b1_ref.shape[-1]
    Tp = x_ref.shape[1] // bblk
    n_taps = len(_OFFSETS)

    # Padded block, loaded once, already flat as matmul rows (bblk*Tp, C).
    x2 = x_ref[0]

    # ONE wide MXU matmul: all 7 folded conv taps + fc1, N-packed.
    y = jnp.dot(x2, wp_ref[...], preferred_element_type=jnp.float32)
    y = y.reshape(bblk, Tp, n_taps * C + Ch)          # leading split; Tp % 8 == 0

    # ---- dilated temporal conv branch: 7 shifted windows of Y, summed on the VPU ----
    off = _OFFSETS[0]
    conv = y[:, _PAD + off:_PAD + off + T, 0:C]
    for s in range(1, n_taps):
        off = _OFFSETS[s]
        conv = conv + y[:, _PAD + off:_PAD + off + T, s * C:(s + 1) * C]

    # ---- instance (frame-wise) branch: fc1 output = last Ch columns of Y ----
    y1 = y[:, _PAD:_PAD + T, n_taps * C:]             # x_center @ fc1^T  (bblk, T, Ch)
    mu = jnp.mean(y1, axis=1, keepdims=True)          # frame mean, folded through fc1
    h = jnp.maximum(y1 - mu + b1_ref[...], 0.0).astype(jnp.bfloat16)
    inst = jnp.dot(h.reshape(bblk * T, Ch), w2t_ref[...],
                   preferred_element_type=jnp.float32).reshape(bblk, T, C)

    # single merged bias add (b2 + fuse bias + conv biases pushed through the fuse)
    o_ref[...] = conv + inst + bias_ref[...]


def _pick_bblk(B, T, target_rows=4096):
    """Batch-block size: ~target_rows matmul rows per grid step; >= 2 grid steps
    when B >= 2 (so both v7x TensorCores get work); no divisor constraint on B
    (the wrapper pads the batch up to a multiple of bblk)."""
    bblk = max(1, target_rows // max(T, 1))
    if B >= 2:
        bblk = min(bblk, (B + 1) // 2)
    else:
        bblk = 1
    return max(1, bblk)


def sgp_forward(x, params):
    B, T, C = x.shape
    Ch = C // 2
    f32, bf16 = jnp.float32, jnp.bfloat16
    n_taps = len(_OFFSETS)

    # ---- host-side weight preparation (all folding in f32) ----
    # 1x1 fuse conv slices, one (C, C) per dilation: wf_d[j, o] = fw[o, d*C + j]
    wf = [params["fw"][:, i * C:(i + 1) * C, 0].T.astype(f32) for i in range(3)]

    # fold fuse into the dilated taps and merge taps sharing a temporal offset
    off_w = {off: jnp.zeros((C, C), f32) for off in _OFFSETS}
    for di, d in enumerate((1, 2, 3)):
        cw = params[f"cw{d}"].astype(f32)                    # (C_out, C_in, 3)
        for k in range(3):
            off = (k - 1) * d
            off_w[off] = off_w[off] + cw[:, :, k].T @ wf[di]

    # N-packed RHS: [tap_{-3} | ... | tap_{+3} | fc1^T]  ->  (C, 7C + C/2)
    wp = jnp.concatenate(
        [off_w[o] for o in _OFFSETS] + [params["w1"].T.astype(f32)],
        axis=1).astype(bf16)
    NP = n_taps * C + Ch

    # merged bias: b2 + fuse bias + sum_d(conv-bias_d pushed through the fuse)
    bias = params["b2"].astype(f32) + params["fb"].astype(f32)
    for di, d in enumerate((1, 2, 3)):
        bias = bias + params[f"cb{d}"].astype(f32) @ wf[di]
    bias = bias.reshape(1, C)

    b1 = params["b1"].reshape(1, Ch).astype(f32)
    w2t = params["w2"].T.astype(bf16)                        # (C/2, C)

    # ---- batch blocking: pad B, pre-flatten padded rows per grid step ----
    bblk = _pick_bblk(B, T)
    G = -(-B // bblk)                 # grid steps (>= 2 whenever B >= 2)
    Bp = G * bblk
    Tp = T + 2 * _PAD

    xpad = jnp.pad(x, ((0, Bp - B), (_PAD, _PAD), (0, 0))).astype(bf16)
    xpad = xpad.reshape(G, bblk * Tp, C)      # flat matmul rows per grid step

    out = pl.pallas_call(
        sgp_kernel,
        out_shape=jax.ShapeDtypeStruct((Bp, T, C), f32),
        grid_spec=pltpu.PrefetchScalarGridSpec(
            num_scalar_prefetch=0,
            grid=(G,),
            in_specs=[
                pl.BlockSpec((1, bblk * Tp, C), lambda i: (i, 0, 0)),  # padded x rows
                pl.BlockSpec((C, NP), lambda i: (0, 0)),               # packed RHS (bf16)
                pl.BlockSpec((1, Ch), lambda i: (0, 0)),               # b1    (f32)
                pl.BlockSpec((Ch, C), lambda i: (0, 0)),               # fc2^T (bf16)
                pl.BlockSpec((1, C), lambda i: (0, 0)),                # merged bias (f32)
            ],
            out_specs=pl.BlockSpec((bblk, T, C), lambda i: (i, 0, 0)),
        ),
        compiler_params=pltpu.CompilerParams(
            dimension_semantics=("parallel",),
            vmem_limit_bytes=48 * 1024 * 1024),
    )(xpad, wp, b1, w2t, bias)

    return out[:B]


# ---------------- pure-JAX f32 reference (for correctness check) ----------------
def sgp_reference(x, p):
    xm = x.mean(axis=1, keepdims=True)
    xi = x - xm
    h = jax.nn.relu(xi @ p["w1"].T + p["b1"])
    inst = h @ p["w2"].T + p["b2"]

    xw = jnp.transpose(x, (0, 2, 1))  # (B, C, T)

    def conv(z, w, b, d):
        o = jax.lax.conv_general_dilated(
            z, w, window_strides=(1,), padding=[(d, d)], rhs_dilation=(d,),
            dimension_numbers=("NCH", "OIH", "NCH"))
        return o + b[None, :, None]

    x1 = conv(xw, p["cw1"], p["cb1"], 1)
    x2 = conv(xw, p["cw2"], p["cb2"], 2)
    x3 = conv(xw, p["cw3"], p["cb3"], 3)
    xcat = jnp.concatenate([x1, x2, x3], axis=1)
    fused = jax.lax.conv_general_dilated(
        xcat, p["fw"], window_strides=(1,), padding=[(0, 0)],
        dimension_numbers=("NCH", "OIH", "NCH")) + p["fb"][None, :, None]
    return inst + jnp.transpose(fused, (0, 2, 1))


def init_params(key, C):
    Ch = C // 2
    ks = jax.random.split(key, 12)
    u = lambda k, shape, fan_in: jax.random.uniform(
        k, shape, jnp.float32, -1.0 / jnp.sqrt(fan_in), 1.0 / jnp.sqrt(fan_in))
    return {
        "w1": u(ks[0], (Ch, C), C), "b1": u(ks[1], (Ch,), C),
        "w2": u(ks[2], (C, Ch), Ch), "b2": u(ks[3], (C,), Ch),
        "cw1": u(ks[4], (C, C, 3), C * 3), "cb1": u(ks[5], (C,), C * 3),
        "cw2": u(ks[6], (C, C, 3), C * 3), "cb2": u(ks[7], (C,), C * 3),
        "cw3": u(ks[8], (C, C, 3), C * 3), "cb3": u(ks[9], (C,), C * 3),
        "fw": u(ks[10], (C, 3 * C, 1), 3 * C), "fb": u(ks[11], (C,), 3 * C),
    }


if __name__ == "__main__":
    B, T, C = 2, 16, 32
    key = jax.random.PRNGKey(0)
    kx, kp = jax.random.split(key)
    x = jax.random.normal(kx, (B, T, C), jnp.float32)
    params = init_params(kp, C)

    out = jax.block_until_ready(sgp_forward(x, params))
    ref = sgp_reference(x, params)

    assert out.shape == (B, T, C)
    err = jnp.max(jnp.abs(out - ref))
    # Kernel uses bf16 matmul operands (f32 accumulation); compare against the
    # exact f32 reference with a bf16-appropriate tolerance.
    assert jnp.allclose(out, ref, atol=5e-2, rtol=5e-2), f"max err {err}"
    print("KERNEL_OK")
</pallas_src>

<mosaic_0001>
module attributes {stable_mosaic.version = 11 : i64} {
  func.func @sgp_kernel(%arg0: i32, %arg1: memref<1x24x32xbf16, #tpu.memory_space<vmem>>, %arg2: memref<32x240xbf16, #tpu.memory_space<vmem>>, %arg3: memref<1x16xf32, #tpu.memory_space<vmem>>, %arg4: memref<16x32xbf16, #tpu.memory_space<vmem>>, %arg5: memref<1x32xf32, #tpu.memory_space<vmem>>, %arg6: memref<1x16x32xf32, #tpu.memory_space<vmem>>) attributes {dimension_semantics = [#tpu.dimension_semantics<parallel>], iteration_bounds = array<i64: 2>, scalar_prefetch = 0 : i64, scratch_operands = 0 : i64, tpu.core_type = #tpu.core_type<tc>, window_params = [{transform_indices = @transform_0, window_bounds = array<i64: 1, 24, 32>}, {pipeline_mode = #tpu.pipeline_mode<synchronous>, transform_indices = @transform_1, window_bounds = array<i64: 32, 240>}, {pipeline_mode = #tpu.pipeline_mode<synchronous>, transform_indices = @transform_2, window_bounds = array<i64: 1, 16>}, {pipeline_mode = #tpu.pipeline_mode<synchronous>, transform_indices = @transform_3, window_bounds = array<i64: 16, 32>}, {pipeline_mode = #tpu.pipeline_mode<synchronous>, transform_indices = @transform_4, window_bounds = array<i64: 1, 32>}, {transform_indices = @transform_5, window_bounds = array<i64: 1, 16, 32>}]} {
    %c0 = arith.constant 0 : index
    %c0_0 = arith.constant 0 : index
    %c0_1 = arith.constant 0 : index
    %0 = vector.load %arg1[%c0, %c0_0, %c0_1] : memref<1x24x32xbf16, #tpu.memory_space<vmem>>, vector<1x24x32xbf16>
    %1 = vector.shape_cast %0 : vector<1x24x32xbf16> to vector<24x32xbf16>
    %c0_2 = arith.constant 0 : index
    %c0_3 = arith.constant 0 : index
    %2 = vector.load %arg2[%c0_2, %c0_3] : memref<32x240xbf16, #tpu.memory_space<vmem>>, vector<32x240xbf16>
    %cst = arith.constant dense<0.000000e+00> : vector<24x240xf32>
    %3 = tpu.matmul %1, %2, %cst {dimension_numbers = #tpu.dot_dimension_numbers<[1], [0], [0], [1], [0, 0, 1, 1], [], []>} : vector<24x32xbf16>, vector<32x240xbf16>, vector<24x240xf32> -> vector<24x240xf32>
    %4 = vector.shape_cast %3 : vector<24x240xf32> to vector<1x24x240xf32>
    %5 = vector.extract_strided_slice %4 {offsets = [0, 1, 0], sizes = [1, 16, 32], strides = [1, 1, 1]} : vector<1x24x240xf32> to vector<1x16x32xf32>
    %6 = vector.extract_strided_slice %4 {offsets = [0, 2, 32], sizes = [1, 16, 32], strides = [1, 1, 1]} : vector<1x24x240xf32> to vector<1x16x32xf32>
    %7 = arith.addf %5, %6 : vector<1x16x32xf32>
    %8 = vector.extract_strided_slice %4 {offsets = [0, 3, 64], sizes = [1, 16, 32], strides = [1, 1, 1]} : vector<1x24x240xf32> to vector<1x16x32xf32>
    %9 = arith.addf %7, %8 : vector<1x16x32xf32>
    %10 = vector.extract_strided_slice %4 {offsets = [0, 4, 96], sizes = [1, 16, 32], strides = [1, 1, 1]} : vector<1x24x240xf32> to vector<1x16x32xf32>
    %11 = arith.addf %9, %10 : vector<1x16x32xf32>
    %12 = vector.extract_strided_slice %4 {offsets = [0, 5, 128], sizes = [1, 16, 32], strides = [1, 1, 1]} : vector<1x24x240xf32> to vector<1x16x32xf32>
    %13 = arith.addf %11, %12 : vector<1x16x32xf32>
    %14 = vector.extract_strided_slice %4 {offsets = [0, 6, 160], sizes = [1, 16, 32], strides = [1, 1, 1]} : vector<1x24x240xf32> to vector<1x16x32xf32>
    %15 = arith.addf %13, %14 : vector<1x16x32xf32>
    %16 = vector.extract_strided_slice %4 {offsets = [0, 7, 192], sizes = [1, 16, 32], strides = [1, 1, 1]} : vector<1x24x240xf32> to vector<1x16x32xf32>
    %17 = arith.addf %15, %16 : vector<1x16x32xf32>
    %18 = vector.extract_strided_slice %4 {offsets = [0, 4, 224], sizes = [1, 16, 16], strides = [1, 1, 1]} : vector<1x24x240xf32> to vector<1x16x16xf32>
    %cst_4 = arith.constant dense<0.000000e+00> : vector<1x16xf32>
    %19 = vector.multi_reduction <add>, %18, %cst_4 [1] : vector<1x16x16xf32> to vector<1x16xf32>
    %20 = vector.shape_cast %19 : vector<1x16xf32> to vector<1x1x16xf32>
    %cst_5 = arith.constant 1.600000e+01 : f32
    %21 = vector.broadcast %cst_5 : f32 to vector<1x1x16xf32>
    %22 = arith.divf %20, %21 : vector<1x1x16xf32>
    %23 = vector.broadcast %22 : vector<1x1x16xf32> to vector<1x16x16xf32>
    %24 = arith.subf %18, %23 : vector<1x16x16xf32>
    %c0_6 = arith.constant 0 : index
    %c0_7 = arith.constant 0 : index
    %25 = vector.load %arg3[%c0_6, %c0_7] : memref<1x16xf32, #tpu.memory_space<vmem>>, vector<1x16xf32>
    %26 = vector.shape_cast %25 : vector<1x16xf32> to vector<1x1x16xf32>
    %27 = vector.broadcast %26 : vector<1x1x16xf32> to vector<1x16x16xf32>
    %28 = arith.addf %24, %27 : vector<1x16x16xf32>
    %cst_8 = arith.constant 0.000000e+00 : f32
    %29 = vector.broadcast %cst_8 : f32 to vector<1x16x16xf32>
    %30 = arith.maximumf %28, %29 : vector<1x16x16xf32>
    %31 = arith.truncf %30 : vector<1x16x16xf32> to vector<1x16x16xbf16>
    %32 = vector.shape_cast %31 : vector<1x16x16xbf16> to vector<16x16xbf16>
    %c0_9 = arith.constant 0 : index
    %c0_10 = arith.constant 0 : index
    %33 = vector.load %arg4[%c0_9, %c0_10] : memref<16x32xbf16, #tpu.memory_space<vmem>>, vector<16x32xbf16>
    %cst_11 = arith.constant dense<0.000000e+00> : vector<16x32xf32>
    %34 = tpu.matmul %32, %33, %cst_11 {dimension_numbers = #tpu.dot_dimension_numbers<[1], [0], [0], [1], [0, 0, 1, 1], [], []>} : vector<16x16xbf16>, vector<16x32xbf16>, vector<16x32xf32> -> vector<16x32xf32>
    %35 = vector.shape_cast %34 : vector<16x32xf32> to vector<1x16x32xf32>
    %36 = arith.addf %17, %35 : vector<1x16x32xf32>
    %c0_12 = arith.constant 0 : index
    %c0_13 = arith.constant 0 : index
    %37 = vector.load %arg5[%c0_12, %c0_13] : memref<1x32xf32, #tpu.memory_space<vmem>>, vector<1x32xf32>
    %38 = vector.shape_cast %37 : vector<1x32xf32> to vector<1x1x32xf32>
    %39 = vector.broadcast %38 : vector<1x1x32xf32> to vector<1x16x32xf32>
    %40 = arith.addf %36, %39 : vector<1x16x32xf32>
    %c0_14 = arith.constant 0 : index
    %c0_15 = arith.constant 0 : index
    %c0_16 = arith.constant 0 : index
    %41 = vector.load %arg6[%c0_14, %c0_15, %c0_16] : memref<1x16x32xf32, #tpu.memory_space<vmem>>, vector<1x16x32xf32>
    tpu.vector_store %arg6[%c0_14, %c0_15, %c0_16], %40 {strides = array<i32>} : memref<1x16x32xf32, #tpu.memory_space<vmem>>, vector<1x16x32xf32>,
    return
  }
  func.func @transform_0(%arg0: i32) -> (i32, i32, i32) {
    %c0_i32 = arith.constant 0 : i32
    %c0_i32_0 = arith.constant 0 : i32
    %c0_i32_1 = arith.constant 0 : i32
    return %arg0, %c0_i32, %c0_i32_0 : i32, i32, i32
  }
  func.func @transform_1(%arg0: i32) -> (i32, i32) {
    %c0_i32 = arith.constant 0 : i32
    %c0_i32_0 = arith.constant 0 : i32
    %c0_i32_1 = arith.constant 0 : i32
    return %c0_i32, %c0_i32_0 : i32, i32
  }
  func.func @transform_2(%arg0: i32) -> (i32, i32) {
    %c0_i32 = arith.constant 0 : i32
    %c0_i32_0 = arith.constant 0 : i32
    %c0_i32_1 = arith.constant 0 : i32
    return %c0_i32, %c0_i32_0 : i32, i32
  }
  func.func @transform_3(%arg0: i32) -> (i32, i32) {
    %c0_i32 = arith.constant 0 : i32
    %c0_i32_0 = arith.constant 0 : i32
    %c0_i32_1 = arith.constant 0 : i32
    return %c0_i32, %c0_i32_0 : i32, i32
  }
  func.func @transform_4(%arg0: i32) -> (i32, i32) {
    %c0_i32 = arith.constant 0 : i32
    %c0_i32_0 = arith.constant 0 : i32
    %c0_i32_1 = arith.constant 0 : i32
    return %c0_i32, %c0_i32_0 : i32, i32
  }
  func.func @transform_5(%arg0: i32) -> (i32, i32, i32) {
    %c0_i32 = arith.constant 0 : i32
    %c0_i32_0 = arith.constant 0 : i32
    %c0_i32_1 = arith.constant 0 : i32
    return %arg0, %c0_i32, %c0_i32_0 : i32, i32, i32
  }
}

</mosaic_0001>

<bundles_post_ra>
// kernel: tpu_custom_call.1
= control target key start
LH: loop header
LB: loop body
LE: loop exit
PB: predicated region body
PF: predicated region fallthrough
CT: control target
= control target key end

     0   :  { %10 = vsyncpa [#allocation3], 0  ;;  %s1255_s0 = inlined_call_operand.hbm [shape: bf16[2,24,32], index: 0, kind: input, shape index: {}]   ;;  %s1256_s1 = inlined_call_operand.hbm [shape: bf16[32,240], index: 1, kind: input, shape index: {}]   ;;  %s1257_s2 = inlined_call_operand.vmem [shape: f32[1,16], index: 2, kind: input, shape index: {}]   ;;  %s1258_s3 = inlined_call_operand.vmem [shape: bf16[16,32], index: 3, kind: input, shape index: {}]   ;;  %s1259_s4 = inlined_call_operand.vmem [shape: f32[1,32], index: 4, kind: input, shape index: {}]   ;;  %s1260_s5 = inlined_call_operand.hbm [shape: f32[2,16,32], index: 5, kind: output, shape index: {}]  }
   0x1   :  { %12 = vsyncpa [#allocation3 + $0x1], 0 }
   0x2   :  { %13 = vsyncpa [#allocation6], 0 }
   0x3   :  { %14 = vsyncpa [#allocation4], 0 }
   0x4   :  { %16 = vsyncpa [#allocation4 + $0x1], 0  ;;  %s967_s18 = smov 0   ;;  %s969_s19 = smov 0  }
   0x5   :  { %s971_s20 = smov 0   ;;  %s973_s21 = smov 0  }
   0x6 LB: > { %s988_s22 = sadd.s32 4294967295, %s920_s21   ;;  %s677_s23 = sadd.s32 4294967294, %s920_s21   ;;  %s920_s21 = sphi %s973_s21, %s1280_s21   ;;  %s916_s20 = sphi %s971_s20, %s1279_s20   ;;  %s912_s19 = sphi %s969_s19, %s1278_s19   ;;  %s908_s18 = sphi %s967_s18, %s1277_s18  }
   0x7   : > { %p42_p0 = scmp.ne.s32.totalorder %s912_s19, %s908_s18  ;;  %p1261_p1 = scmp.eq.s32.totalorder %s988_s22, 0 }
   0x8   : > { %p156_p3 = scmp.eq.s32.totalorder %s677_s23, 1  ;;  %p678_p5 = scmp.ge.s32.totalorder %s920_s21, 1 }
   0x9   : > { %p997_p4 = por %p1261_p1, %p42_p0  ;;  %p163_p7 = scmp.lt.s32.totalorder %s920_s21, 3 }
   0xa   : > { %p1002_p6 = por %p156_p3, %p42_p0  ;;  %s922_s27 = smov [#allocation5]  }
   0xb   : > { %s1264_s24 = scalar_select %p997_p4, 1, 0 }
   0xc   : > { %s1265_s25 = scalar_select %p1002_p6, 1, 0 }
   0xd   : > { %p1007_p8 = pnand %p678_p5, %p163_p7  ;;  %s175_s28 = sshll.u32 %s922_s27, 4  ;;  %s1011_s28 = int_to_ptr.vmem [resolvable:$true] %s175_s28 }
   0xe   : > { %s1023_s30 = sadd.s32 1, %s920_s21   ;;  %s29_s6 = sadd.s32 1, %s916_s20 }
   0xf   : > { %s1266_s26 = scalar_select %p1007_p8, 1, 0 }
  0x10   : > { %p722_p9 = pneg %p1007_p8  ;;  %s26_s7 = ssub.s32 %s920_s21, %s1023_s30 }
  0x11   : > { %s792_s10 = scalar_lea.hbm %s1256_s1, 512 }
  0x12   : > { %p1018_p11 = pnand %p722_p9, %p1261_p1  ;;  %p793_p12 = scmp.ne.s32.totalorder %s1256_s1, %s792_s10 }
  0x13   : > { %p799_p5 = scmp.lt.u32.totalorder %s792_s10, %s1256_s1 }
  0x14   : > { %p794_p13 = pneg %p1018_p11 }
  0x16   : > { %p795_p0 = pnand %p794_p13, %p793_p12 }
  0x18   : > { %p796_p3 = pneg %p795_p0 }
  0x1a   : > { %p801_p7 = pnand %p799_p5, %p796_p3 }
  0x1c   : > { %804 = shalt.err (!%p801_p7)
}
  0x1d   : > { %s805_s15 = scalar_lea.vmem %s1011_s28, 512  ;;  %p813_p2 = scmp.lt.s32.totalorder %s1011_s28, %s1011_s28 }
  0x1e   : > { %p806_p9 = scmp.ne.s32.totalorder %s1011_s28, %s805_s15  ;;  %p814_p6 = scmp.lt.s32.totalorder %s805_s15, %s805_s15 }
  0x20   : > { %p808_p10 = pnand %p806_p9, %p794_p13  ;;  %p815_p4 = por %p814_p6, %p813_p2 }
  0x22   : > { %p809_p1 = pneg %p808_p10 }
  0x24   : > { %p816_p8 = pnand %p815_p4, %p809_p1 }
  0x26   : > { %819 = shalt.err (!%p816_p8)
}
  0x27   : > { %s923_s16 = smov 128   ;;  %s924_s17 = smov 8  }
  0x28   : > { %725 = dma.hbm_to_vmem [thread:$0]  (!%p1018_p11), %s1256_s1, 512, %s1011_s28, [#allocation6], %s923_s16, %s923_s16, %s924_s17  }
  0x29   : > { %p27_p2 = scmp.eq.s32.totalorder %s26_s7, 0  ;;  %p36_p1 = scmp.ne.s32.totalorder %s916_s20, %s912_s19 }
  0x2a   : > { %p37_p4 = scmp.eq.s32.totalorder %s920_s21, 0  ;;  %p735_p6 = scmp.lt.s32.totalorder %s920_s21, 2 }
  0x2b   : > { %s1054_s8 = scalar_select %p27_p2, %s916_s20, %s29_s6  }
  0x2c   : > { %p38_p8 = por %p37_p4, %p36_p1  ;;  %p1268_p10 = scmp.eq.s32.totalorder %s988_s22, 1 }
  0x2d   : > { %s198_s10 = sand.u32 1, %s916_s20   ;;  %s712_s11 = smul.u32 192, %s920_s21 }
  0x2e   : > { %p1058_p12 = por %p1268_p10, %p36_p1  ;;  %s711_s12 = smul.u32 12, %s198_s10 }
  0x2f   : > { %s1067_s14 = scalar_lea.hbm %s1255_s0, %s712_s11  ;;  %p1069_p11 = pnand %p735_p6, %p38_p8 }
  0x30   : > { %s202_s6 = scalar_lea.vmem [#allocation2], %s711_s12  ;;  %s1075_s15 = scalar_lea.sflag [#allocation3], %s198_s10 }
  0x31   : > { %s209_s7 = sshll.u32 %s202_s6, 4  ;;  %s820_s16 = scalar_lea.hbm %s1067_s14, 192  ;;  %s1073_s7 = int_to_ptr.vmem [resolvable:$true] %s209_s7 }
  0x32   : > { %p821_p13 = scmp.ne.s32.totalorder %s1067_s14, %s820_s16  ;;  %p822_p0 = pneg %p1069_p11 }
  0x33   : > { %s825_s27 = scalar_lea.hbm %s1255_s0, 384  ;;  %p826_p7 = scmp.lt.u32.totalorder %s1067_s14, %s1255_s0 }
  0x34   : > { %p823_p3 = pnand %p822_p0, %p821_p13  ;;  %p827_p9 = scmp.lt.u32.totalorder %s825_s27, %s820_s16 }
  0x35   : > { %p829_p1 = scmp.lt.u32.totalorder %s820_s16, %s1067_s14 }
  0x36   : > { %p824_p5 = pneg %p823_p3  ;;  %p828_p2 = por %p827_p9, %p826_p7 }
  0x38   : > { %p830_p4 = por %p829_p1, %p828_p2 }
  0x3a   : > { %p831_p6 = pnand %p830_p4, %p824_p5 }
  0x3c   : > { %834 = shalt.err (!%p831_p6)
}
  0x3d   : > { %s835_s10 = scalar_lea.vmem %s1073_s7, 192  ;;  %s925_s12 = smov [#allocation2]  }
  0x3e   : > { %p836_p8 = scmp.ne.s32.totalorder %s1073_s7, %s835_s10  ;;  %s840_s13 = sshll.u32 %s925_s12, 4  ;;  %s841_s13 = int_to_ptr.vmem [resolvable:$false] %s840_s13 }
  0x3f   : > { %s842_s6 = scalar_lea.vmem %s841_s13, 384  ;;  %p843_p3 = scmp.lt.s32.totalorder %s1073_s7, %s841_s13 }
  0x40   : > { %p838_p10 = pnand %p836_p8, %p822_p0  ;;  %p844_p7 = scmp.lt.s32.totalorder %s842_s6, %s835_s10 }
  0x42   : > { %p839_p13 = pneg %p838_p10  ;;  %p845_p9 = por %p844_p7, %p843_p3 }
  0x44   : > { %p846_p2 = pnand %p845_p9, %p839_p13 }
  0x46   : > { %849 = shalt.err (!%p846_p2)
}
  0x47   : > { %s926_s16 = smov 64   ;;  %s927_s17 = smov 4  }
  0x48   : > { %729 = dma.hbm_to_vmem [thread:$0]  (!%p1069_p11), %s1067_s14, 192, %s1073_s7, %s1075_s15, %s926_s16, %s926_s16, %s927_s17  }
  0x49   : > { %p1271_p0 = scmp.ne.s32.totalorder %s1266_s26, 0 }
  0x4a   : > { %s1106_s23 = sand.u32 (!%p1271_p0), 1, %s912_s19   ;;  %p1272_p5 = scmp.ne.s32.totalorder (!%p1271_p0), %s1264_s24, 0 }
  0x4b   : > { %221 = sbr.rel (%p1271_p0) target bundleno = 698 (0x2ba), region = 40  ;;  %s224_s11 = scalar_lea.sflag (!%p1271_p0), [#allocation3], %s1106_s23 }
  0x4c   : > { %s713_s27 = smul.u32 (!%p1271_p0), 12, %s1106_s23 }
  0x4e   : > { %s227_s29 = scalar_lea.vmem (!%p1271_p0), [#allocation2], %s713_s27 }
  0x52   : > { %895 = dma.done.wait (%p1272_p5), %s224_s11, 192  }
  0x53   : > { %897 = vsyncadd (%p1272_p5), %s224_s11, 4294967104  ;;  %p1273_p1 = scmp.eq.s32.totalorder %s988_s22, 0 }
  0x55   : > { %899 = dma.done.wait (%p1273_p1), [#allocation6], 512   ;;  %p1274_p11 = pmov %p1273_p1 }
  0x56   : > { %v928_v0 = vmov 0   ;;  %v783_v1 = vld [vmem:[#allocation5 + $0x4] ss:$8 sps:$4 sm:$0xff]   ;;  %v785_v2 = vld [vmem:[#allocation5] ss:$8 sps:$4 sm:$0xff]   ;;  %s929_s24 = smov 96  }
  0x57   : > { %901 = vsyncadd (%p1274_p11), [#allocation6], 4294966784  ;;  %333 = vmatprep.mubr.bf16.mxu0 %v928_v0  ;;  %301 = vmatprep.subr.bf16.mxu0 %v783_v1  ;;  %v786_v3 = vld [vmem:[#allocation5 + $0x14] ss:$8 sps:$4 sm:$0xff]   ;;  %v788_v4 = vld [vmem:[#allocation5 + $0x10] ss:$8 sps:$4 sm:$0xff]  }
  0x58   : > { %302 = vmatpush1.bf16.msra.mxu0 %v785_v2  ;;  %v693_v5 = vld [vmem:[%s1257_s2] ss:$0 sm:$0xff]  ;;  %vm294_vm0 = vcmask 261120   ;;  %v790_v7 = vld [vmem:[%s227_s29 + $0x8] ss:$0 sps:$4 sm:$0xff]   ;;  %vm412_vm1 = vcmask 1043456  }
  0x59   : > { %303 = vmatprep.subr.bf16.mxu0 %v786_v3  ;;  %481 = vrot.lane.b32.xlu0 %v693_v5, %s929_s24  ;;  %v789_v6 = vld [vmem:[%s227_s29] sm:$0xff]   ;;  %vm355_vm2 = vcmask 1046528   ;;  %vm373_vm3 = vcmask 1045504   ;;  %vm391_vm4 = vcmask 1044480   ;;  %vm424_vm5 = vcmask 1042432   ;;  %s930_s28 = smov 64  }
  0x5a   : > { %vm442_vm6 = vcmask 1041408   ;;  %vm460_vm7 = vcmask 917248   ;;  %v791_v53 = vld [vmem:[%s1258_s3] sm:$0xff]   ;;  %v931_v54 = vmov 0.0   ;;  %vm932_vm8 = vmmov 0   ;;  %s933_s10 = smov 32  }
  0x5b   : > { %705 = vmatprep.subr.bf16.mxu1 %v931_v54  ;;  %707 = vmatprep.mubr.msk.bf16.mxu1 %vm932_vm8, %v931_v54  ;;  %vm508_vm9 = vcmask 130048   ;;  %s684_s12 = sshll.u32 %s1106_s23, 4  ;;  %vm555_vm10 = vcmask 1040384   ;;  %vm575_vm11 = vcmask 261121   ;;  %s702_s16 = sshll.u32 %s988_s22, 8  ;;  %vm578_vm12 = vcmask 253952  }
  0x5c   : > { %304 = vmatpush1.bf16.msra.mxu0 %v788_v4  ;;  %706 = vmatpush3.bf16.msra.mxu1 %v791_v53  ;;  %s257_s17 = scalar_lea.vmem [#allocation7], %s684_s12  ;;  %s1208_s26 = scalar_lea.hbm %s1260_s5, %s702_s16 }
  0x5d   : > { %s594_s27 = sshll.u32 %s257_s17, 4  ;;  %s581_s22 = scalar_lea.sflag [#allocation4], %s1106_s23  ;;  %s1210_s27 = int_to_ptr.vmem [resolvable:$true] %s594_s27 }
  0x5e   : > { %s850_s14 = scalar_lea.vmem %s1210_s27, 256 }
  0x5f   : > { %691 = vmatmul.mubr.msk.bf16.vlgmr.msra.gmra.mrb[0].mxu0 %vm294_vm0, %v789_v6  ;;  %p851_p4 = scmp.ne.s32.totalorder %s1210_s27, %s850_s14 }
  0x60   : > { %343 = vmatprep.mubr.bf16.mxu0 %v928_v0 }
  0x61   : > { %p852_p6 = pnand %p851_p4, %p1058_p12 }
  0x63   : > { %p853_p8 = pneg %p852_p6 }
  0x67   : > { %692 = vmatmul.mubr.msk.bf16.gmra.mrb[4].mxu0 %vm294_vm0, %v790_v7 }
  0xcb   : > { %v482_v58 = vpop.permute.xlu0 %481 }
 0x132   : > { %v1124_v8 = vpop.f32.mrb[0].mxu0 }
 0x133   : > { %v1126_v9 = vpop.f32.mrb[1].mxu0  ;;  %v374_v10 = vrot.slane %v1124_v8, 2  ;;  %v392_v11 = vrot.slane %v1124_v8, 3  ;;  %v356_v14 = vrot.slane %v1124_v8, 1 }
 0x134   : > { %v413_v12 = vrot.slane %v1126_v9, 4  ;;  %v1131_v13 = vpop.f32.mrb[2].mxu0  ;;  %v425_v15 = vrot.slane %v1126_v9, 5  ;;  %v443_v20 = vrot.slane %v1126_v9, 6 }
 0x135   : > { %v375_v16 = vrot.slane %v1131_v13, 2  ;;  %v393_v17 = vrot.slane %v1131_v13, 3  ;;  %v341_v18 = vpop.f32.mrb[3].mxu0  ;;  %v357_v19 = vrot.slane %v1131_v13, 1 }
 0x136   : > { %v414_v21 = vrot.slane %v341_v18, 4  ;;  %v426_v22 = vrot.slane %v341_v18, 5  ;;  %v444_v23 = vrot.slane %v341_v18, 6 }
 0x137   : > { %v358_v24 = vsel %vm355_vm2, %v356_v14, %v357_v19  ;;  %v376_v25 = vsel %vm373_vm3, %v374_v10, %v375_v16  ;;  %v1142_v26 = vsel %vm391_vm4, %v392_v11, %v393_v17 }
 0x138   : > { %v1145_v27 = vsel %vm412_vm1, %v413_v12, %v414_v21  ;;  %361 = vrot.lane.b32.xlu1 %v358_v24, %s929_s24  ;;  %v427_v28 = vsel %vm424_vm5, %v425_v15, %v426_v22  ;;  %v1150_v29 = vsel %vm442_vm6, %v443_v20, %v444_v23 }
 0x139   : > { %v461_v46 = vsel %vm460_vm7, %v1145_v27, 0.0 }
 0x13a   : > { %v1152_v30 = vpop.f32.mrb[4].mxu0 }
 0x13b   : > { %v359_v31 = vrot.slane %v1152_v30, 1  ;;  %v395_v32 = vrot.slane %v1152_v30, 3  ;;  %v1156_v33 = vpop.f32.mrb[5].mxu0  ;;  %v377_v34 = vrot.slane %v1152_v30, 2 }
 0x13c   : > { %v416_v35 = vrot.slane %v1156_v33, 4  ;;  %v446_v36 = vrot.slane %v1156_v33, 6  ;;  %v349_v37 = vpop.f32.mrb[6].mxu0  ;;  %v428_v38 = vrot.slane %v1156_v33, 5 }
 0x13d   : > { %v350_v39 = vpop.f32.mrb[7].mxu0  ;;  %v360_v40 = vsel %vm355_vm2, %v357_v19, %v359_v31  ;;  %v396_v41 = vsel %vm391_vm4, %v393_v17, %v395_v32  ;;  %v378_v42 = vsel %vm373_vm3, %v375_v16, %v377_v34 }
 0x13e   : > { %v1168_v43 = vsel %vm412_vm1, %v414_v21, %v416_v35  ;;  %363 = vrot.lane.b32.xlu1 %v360_v40, %s929_s24  ;;  %v447_v44 = vsel %vm442_vm6, %v444_v23, %v446_v36  ;;  %v429_v45 = vsel %vm424_vm5, %v426_v22, %v428_v38 }
 0x13f   : > { %v462_v47 = vsel %vm460_vm7, %v1168_v43, 0.0 }
 0x140   : > { %v463_v48 = vadd.f32 %v462_v47, %v461_v46 }
 0x142   : > { %v464_v49 = vrot.slane %v463_v48, 4  ;;  %379 = vrot.lane.b32.xlu1 %v376_v25, %s930_s28 }
 0x144   : > { %v465_v50 = vadd.f32 %v464_v49, %v463_v48 }
 0x146   : > { %383 = vrot.lane.b32.xlu1 %v377_v34, %s930_s28  ;;  %v466_v51 = vrot.slane %v465_v50, 2 }
 0x148   : > { %v467_v52 = vadd.f32 %v466_v51, %v465_v50 }
 0x14a   : > { %399 = vrot.lane.b32.xlu1 %v396_v41, %s933_s10  ;;  %v468_v55 = vrot.slane %v467_v52, 1 }
 0x14c   : > { %v469_v56 = vadd.f32 %v468_v55, %v467_v52 }
 0x14e   : > { %430 = vrot.lane.b32.xlu1 %v427_v28, %s929_s24  ;;  %v471_v57 = vmul.f32 0.0625, %v469_v56 }
 0x150   : > { %v472_v59 = vsub.f32 %v1126_v9, %v471_v57  ;;  %v473_v60 = vsub.f32 %v341_v18, %v471_v57  ;;  %v474_v61 = vsub.f32 %v1156_v33, %v471_v57 }
 0x152   : > { %v484_v62 = vadd.f32 %v482_v58, %v472_v59  ;;  %v485_v63 = vadd.f32 %v482_v58, %v473_v60  ;;  %v486_v0 = vadd.f32 %v482_v58, %v474_v61  ;;  %434 = vrot.lane.b32.xlu1 %v428_v38, %s929_s24 }
 0x154   : > { %v487_v1 = vmax.f32 %v484_v62, 0.0  ;;  %v488_v2 = vmax.f32 %v485_v63, 0.0  ;;  %v489_v3 = vmax.f32 %v486_v0, 0.0 }
 0x156   : > { %v490_v4 = vpack.c.bf16 %v488_v2, %v487_v1  ;;  %v491_v5 = vpack.c.bf16 %v489_v3, %v489_v3  ;;  %450 = vrot.lane.b32.xlu1 %v447_v44, %s930_s28 }
 0x158   : > { %v498_v6 = vrot.slane %v491_v5, 2  ;;  %v497_v7 = vrot.slane %v490_v4, 2 }
 0x15a   : > { %v499_v10 = vsel %vm373_vm3, %v497_v7, %v498_v6 }
 0x15b   : > { %500 = vrot.lane.b32.xlu0 %v499_v10, %s933_s10 }
 0x15f   : > { %365 = vrot.lane.b32.xlu0 %v359_v31, %s929_s24 }
 0x163   : > { %381 = vrot.lane.b32.xlu0 %v378_v42, %s930_s28 }
 0x167   : > { %397 = vrot.lane.b32.xlu0 %v1142_v26, %s933_s10 }
 0x16b   : > { %401 = vrot.lane.b32.xlu0 %v395_v32, %s933_s10 }
 0x16f   : > { %432 = vrot.lane.b32.xlu0 %v429_v45, %s929_s24  ;;  %s934_s24 = smov [#allocation7]  }
 0x173   : > { %448 = vrot.lane.b32.xlu0 %v1150_v29, %s930_s28 }
 0x177   : > { %452 = vrot.lane.b32.xlu0 %v446_v36, %s930_s28  ;;  %s854_s28 = sshll.u32 %s934_s24, 4  ;;  %s855_s28 = int_to_ptr.vmem [resolvable:$false] %s854_s28 }
 0x178   : > { %s856_s7 = scalar_lea.vmem %s855_s28, 512  ;;  %p857_p10 = scmp.lt.s32.totalorder %s1210_s27, %s855_s28 }
 0x179   : > { %p858_p13 = scmp.lt.s32.totalorder %s856_s7, %s850_s14 }
 0x17b   : > { %p859_p3 = por %p858_p13, %p857_p10 }
 0x17d   : > { %p860_p7 = pnand %p859_p3, %p853_p8 }
 0x1aa   : > { %v362_v11 = vpop.permute.xlu1 %361 }
 0x1ab   : > { %v370_v21 = vadd.f32 %v362_v11, %v1124_v8 }
 0x1b0   : > { %v364_v14 = vpop.permute.xlu1 %363 }
 0x1b1   : > { %v371_v23 = vadd.f32 %v364_v14, %v1131_v13 }
 0x1b4   : > { %v380_v16 = vpop.permute.xlu1 %379 }
 0x1b5   : > { %v388_v25 = vadd.f32 %v380_v16, %v370_v21 }
 0x1b8   : > { %v384_v18 = vpop.permute.xlu1 %383 }
 0x1bc   : > { %v400_v20 = vpop.permute.xlu1 %399 }
 0x1c0   : > { %v431_v28 = vpop.permute.xlu1 %430 }
 0x1c4   : > { %v435_v38 = vpop.permute.xlu1 %434 }
 0x1c8   : > { %v451_v33 = vpop.permute.xlu1 %450 }
 0x1cd   : > { %v501_v9 = vpop.permute.xlu0 %500 }
 0x1ce   : > { %708 = vmatmul.mubr.msk.bf16.vlgmr.msra.gmra.mrb[0].mxu1 %vm508_vm9, %v501_v9 }
 0x1d1   : > { %v366_v12 = vpop.permute.xlu0 %365 }
 0x1d2   : > { %v372_v22 = vadd.f32 %v366_v12, %v1152_v30 }
 0x1d4   : > { %v390_v31 = vadd.f32 %v384_v18, %v372_v22 }
 0x1d5   : > { %v382_v15 = vpop.permute.xlu0 %381 }
 0x1d6   : > { %v389_v26 = vadd.f32 %v382_v15, %v371_v23 }
 0x1d8   : > { %v407_v34 = vadd.f32 %v400_v20, %v389_v26 }
 0x1d9   : > { %v398_v17 = vpop.permute.xlu0 %397 }
 0x1da   : > { %v406_v29 = vadd.f32 %v398_v17, %v388_v25  ;;  %v422_v30 = vadd.f32 %v1168_v43, %v407_v34 }
 0x1dc   : > { %v421_v37 = vadd.f32 %v1145_v27, %v406_v29  ;;  %v696_v27 = vld [vmem:[%s1259_s4] ss:$0 sm:$0xff] }
 0x1dd   : > { %v402_v19 = vpop.permute.xlu0 %401 }
 0x1de   : > { %v408_v32 = vadd.f32 %v402_v19, %v390_v31  ;;  %v439_v39 = vadd.f32 %v431_v28, %v421_v37 }
 0x1e0   : > { %v423_v8 = vadd.f32 %v416_v35, %v408_v32 }
 0x1e1   : > { %v433_v24 = vpop.permute.xlu0 %432 }
 0x1e2   : > { %v440_v13 = vadd.f32 %v433_v24, %v422_v30  ;;  %v441_v44 = vadd.f32 %v435_v38, %v423_v8 }
 0x1e4   : > { %v458_v50 = vadd.f32 %v451_v33, %v440_v13 }
 0x1e5   : > { %v449_v36 = vpop.permute.xlu0 %448 }
 0x1e6   : > { %v457_v42 = vadd.f32 %v449_v36, %v439_v39 }
 0x1e9   : > { %v453_v40 = vpop.permute.xlu0 %452 }
 0x1ea   : > { %v459_v35 = vadd.f32 %v453_v40, %v441_v44 }
 0x2a1   : > { %v546_v41 = vpop.f32.mrb[0].mxu1 }
 0x2a2   : > { %v556_v45 = vrot.slane %v546_v41, 7  ;;  %v709_v46 = vpop.f32.mrb[1].mxu1 }
 0x2a3   : > { %v549_v47 = vpop.f32.mrb[2].mxu1 }
 0x2a4   : > { %v562_v48 = vadd.f32 %v556_v45, %v457_v42  ;;  %v557_v43 = vrot.slane %v549_v47, 7  ;;  %v710_v49 = vpop.f32.mrb[3].mxu1 }
 0x2a6   : > { %v572_v51 = vadd.f32 %v696_v27, %v562_v48  ;;  %v558_v52 = vsel %vm555_vm10, %v556_v45, %v557_v43  ;;  %v564_v53 = vadd.f32 %v557_v43, %v459_v35 }
 0x2a7   : > { %v563_v54 = vadd.f32 %v558_v52, %v458_v50 }
 0x2a8   : > { %576 = vst.msk [vmem:[%s257_s17 - $0x1] sm:$0xfe] %vm575_vm11, %v572_v51  ;;  %v574_v55 = vadd.f32 %v696_v27, %v564_v53 }
 0x2a9   : > { %v573_v56 = vadd.f32 %v696_v27, %v563_v54 }
 0x2aa   : > { %579 = vst.msk [vmem:[%s257_s17 + $0xf] sm:$0x1] %vm578_vm12, %v574_v55 }
 0x2ab   : > { %577 = vst.msk [vmem:[%s257_s17 + $0x7] sm:$0xff] %vm294_vm0, %v573_v56 }
 0x2ac   : > { %863 = shalt.err (!%p860_p7)
}
 0x2ad   : > { %s864_s15 = scalar_lea.hbm %s1208_s26, 256  ;;  %s868_s13 = scalar_lea.hbm %s1260_s5, 512 }
 0x2ae   : > { %p865_p9 = scmp.ne.s32.totalorder %s1208_s26, %s864_s15  ;;  %p869_p5 = scmp.lt.u32.totalorder %s1208_s26, %s1260_s5 }
 0x2af   : > { %p870_p1 = scmp.lt.u32.totalorder %s868_s13, %s864_s15  ;;  %p872_p4 = scmp.lt.u32.totalorder %s864_s15, %s1208_s26 }
 0x2b0   : > { %p866_p2 = pnand %p865_p9, %p1058_p12 }
 0x2b1   : > { %p871_p11 = por %p870_p1, %p869_p5 }
 0x2b2   : > { %p867_p0 = pneg %p866_p2 }
 0x2b3   : > { %p873_p6 = por %p872_p4, %p871_p11 }
 0x2b5   : > { %p874_p8 = pnand %p873_p6, %p867_p0 }
 0x2b7   : > { %877 = shalt.err (!%p874_p8)
}
 0x2b8   : > { %s935_s17 = smov 128   ;;  %s936_s11 = smov 8  }
 0x2b9   : > { %720 = dma.vmem_to_hbm [thread:$0]  (%p1058_p12), %s1210_s27, 256, %s1208_s26, %s581_s22, %s935_s17, %s935_s17, %s936_s11  }
 0x2ba PF: > { %s609_s29 = sand.u32 1, %s908_s18   ;;  %p1275_p10 = scmp.ne.s32.totalorder %s1265_s25, 0 }
 0x2bb   : > { %p1276_p13 = scmp.ge.s32.totalorder %s920_s21, 2  ;;  %s610_s14 = scalar_lea.sflag [#allocation4], %s609_s29 }
 0x2bd   : > { %p731_p3 = pnand %p1276_p13, %p1275_p10 }
 0x2bf   : > { %903 = dma.done.wait (!%p731_p3), %s610_s14, 256  }
 0x2c0   : > { %905 = vsyncadd (!%p731_p3), %s610_s14, 4294967040  ;;  %p19_p7 = scmp.ge.s32.totalorder %s1023_s30, 4   ;;  %s1277_s18 = smov %s912_s19 }
 0x2c1   : > { %s1278_s19 = smov %s916_s20  ;;  %s1279_s20 = smov %s1054_s8 }
 0x2c2   : > { %s1280_s21 = smov %s1023_s30  ;;  %21 = sbr.rel (!%p19_p7) target bundleno = 6 (0x6), region = 89 }
 0x2c9   :  { %615 = vsyncpa [#allocation3], 1 }
 0x2ca   :  { %617 = vsyncpa [#allocation3 + $0x1], 1 }
 0x2cb   :  { %618 = vsyncpa [#allocation6], 1 }
 0x2cc   :  { %619 = vsyncpa [#allocation4], 1 }
 0x2cd   :  { %621 = vsyncpa [#allocation4 + $0x1], 1 }

</bundles_post_ra>
